<compile_context>
chip_gen: v7x
topology: tpu7x:2x2x1
jax: 0.10.0
libtpu: 0.0.40
codegen_flags: <defaults>
</compile_context>

<pallas_src>
import jax
import jax.numpy as jnp
import numpy as np
from jax.experimental import pallas as pl
from jax.experimental.pallas import tpu as pltpu

V_THRESHOLD = 1.0


def _deconv_if_kernel(x_ref, w_ref, b_ref, o_ref):
    # x_ref: (1, Cin, tm) f32   input pixels, lanes = flat spatial index
    # w_ref: (R, Cin)     f32   rows ordered (oc, kh, kw), R = 4*Cout
    # b_ref: (R, 1)       f32   bias per row
    # o_ref: (1, R, tm)   int8  spikes {0, 1}
    acc = jnp.dot(w_ref[...], x_ref[0], preferred_element_type=jnp.float32)
    # add-then-compare matches PyTorch (conv + bias) >= v_threshold bit-exactly
    o_ref[0] = ((acc + b_ref[...]) >= V_THRESHOLD).astype(o_ref.dtype)


def _choose_lane_tile(hw, n, cin, r, spike_bytes):
    """Lane tile (multiple of 128) from a VMEM budget + v7x parallelism needs."""
    cdiv = lambda a, b: -(-a // b)
    rup = lambda v, m: cdiv(v, m) * m

    if hw <= 128:                                  # tiny image: one full-width block
        return hw, 1

    # Double-buffered in/out blocks + the in-flight f32 dot result, bytes per lane.
    per_lane = 2 * cin * 4 + 2 * r * spike_bytes + r * 4
    tm = (6 * 1024 * 1024) // per_lane             # ~6 MiB working set (fits all gens)
    tm = min(tm, (512 * 1024) // (4 * r))          # bound f32 acc staging to 512 KiB
    tm = min(tm, 2048)                             # >=1024 lanes already ~85% roofline
    tm = min(tm, rup(hw, 128))
    tm = max(128, (tm // 128) * 128)

    # v7x has 2 TensorCores: need >=2 "parallel" grid steps, prefer >=4,
    # but never shrink tiles below 512 lanes just for step count.
    if n * cdiv(hw, tm) < 2:
        tm = max(128, min(tm, rup(cdiv(hw, 2), 128)))
    if n * cdiv(hw, tm) < 4 and tm > 512:
        want = rup(cdiv(hw, cdiv(4, n)), 128)
        tm = max(512, min(tm, want))

    return tm, cdiv(hw, tm)


def upsample_layer_with_if(x_nchw, weight, bias, out_dtype=jnp.float32):
    """x_nchw: (N, Cin, H, W); weight: (Cin, Cout, 2, 2) [PyTorch ConvTranspose2d layout];
    bias: (Cout,).  Returns (N, Cout, 2H, 2W) spikes in {0, 1} as out_dtype."""
    N, Cin, H, W = x_nchw.shape
    Cout = weight.shape[1]
    HW = H * W
    R = 4 * Cout

    # int8 is exact for {0,1}; fall back to bf16 only if R breaks the (32,128) tiling.
    spike_dtype = jnp.int8 if (R % 32 == 0) else jnp.bfloat16
    spike_bytes = jnp.dtype(spike_dtype).itemsize

    # weight (Cin, Cout, kh, kw) -> (R, Cin), row r = oc*4 + kh*2 + kw
    w_mat = jnp.transpose(weight, (1, 2, 3, 0)).reshape(R, Cin).astype(jnp.float32)
    b_col = jnp.repeat(bias.astype(jnp.float32), 4).reshape(R, 1)

    # NCHW -> (N, Cin, H*W): free reshape, no transpose, no pad pass.
    x_flat = x_nchw.reshape(N, Cin, HW).astype(jnp.float32)

    tm, num_tiles = _choose_lane_tile(HW, N, Cin, R, spike_bytes)

    # Explicit scoped-VMEM limit: >= every generation's default, << v7x's 64 MiB physical.
    ws_bytes = 2 * (Cin * tm * 4 + R * tm * spike_bytes + R * Cin * 4 + R * 4) + R * tm * 4
    vmem_limit = int(min(48 * 2**20, max(32 * 2**20, 4 * ws_bytes)))

    out_flat = pl.pallas_call(
        _deconv_if_kernel,
        out_shape=jax.ShapeDtypeStruct((N, R, HW), spike_dtype),
        grid_spec=pltpu.PrefetchScalarGridSpec(
            num_scalar_prefetch=0,
            grid=(N, num_tiles),
            in_specs=[
                pl.BlockSpec((1, Cin, tm), lambda n, i: (n, 0, i)),
                pl.BlockSpec((R, Cin), lambda n, i: (0, 0)),
                pl.BlockSpec((R, 1), lambda n, i: (0, 0)),
            ],
            out_specs=pl.BlockSpec((1, R, tm), lambda n, i: (n, 0, i)),
        ),
        compiler_params=pltpu.CompilerParams(
            dimension_semantics=("parallel", "parallel"),
            vmem_limit_bytes=vmem_limit),
    )(x_flat, w_mat, b_col)

    # Epilogue: (N, R, HW) -> NCHW.  Single fused XLA pass over the compact int8
    # tensor (1 B/elem read); the final-dtype write is the unavoidable output store.
    out = out_flat.reshape(N, Cout, 2, 2, H, W)
    out = jnp.transpose(out, (0, 1, 4, 2, 5, 3)).reshape(N, Cout, 2 * H, 2 * W)
    return out.astype(out_dtype)


def _reference_preact(x_nchw, weight, bias):
    """Plain-JAX pre-activation of ConvTranspose2d(k=2, s=2) in NCHW."""
    N, Cin, H, W = x_nchw.shape
    Cout = weight.shape[1]
    y = jnp.einsum("ncij,cohw->nohwij", x_nchw, weight,
                   precision=jax.lax.Precision.HIGHEST) \
        + bias[None, :, None, None, None, None]
    y = jnp.transpose(y, (0, 1, 4, 2, 5, 3)).reshape(N, Cout, 2 * H, 2 * W)
    return y


if __name__ == "__main__":
    key = jax.random.PRNGKey(0)
    k_x, k_w, k_b = jax.random.split(key, 3)

    N, Cin, Cout, H, W = 2, 4, 8, 16, 16
    x = jax.random.normal(k_x, (N, Cin, H, W), dtype=jnp.float32)
    # ConvTranspose2d weight shape: (in_channels, out_channels, kh, kw)
    fan = Cin * 2 * 2
    bound = 1.0 / np.sqrt(fan)
    weight = jax.random.uniform(k_w, (Cin, Cout, 2, 2), jnp.float32, -bound, bound)
    bias = jax.random.uniform(k_b, (Cout,), jnp.float32, -bound, bound)

    out = jax.block_until_ready(upsample_layer_with_if(x, weight, bias))

    pre = jax.block_until_ready(_reference_preact(x, weight, bias))
    ref = (pre >= V_THRESHOLD).astype(jnp.float32)

    assert out.shape == (N, Cout, 2 * H, 2 * W)
    out_np, ref_np, pre_np = np.asarray(out), np.asarray(ref), np.asarray(pre)
    # exact match except (theoretically) where the pre-activation sits within float
    # rounding distance of the threshold
    agree = (out_np == ref_np) | (np.abs(pre_np - V_THRESHOLD) < 1e-5)
    assert agree.all(), f"mismatches: {np.count_nonzero(~agree)}"
    assert set(np.unique(out_np)).issubset({0.0, 1.0})
    print("KERNEL_OK")
</pallas_src>

<mosaic_0001>
module attributes {stable_mosaic.version = 11 : i64} {
  func.func @_deconv_if_kernel(%arg0: i32, %arg1: i32, %arg2: memref<1x4x256xf32, #tpu.memory_space<vmem>>, %arg3: memref<32x4xf32, #tpu.memory_space<vmem>>, %arg4: memref<32x1xf32, #tpu.memory_space<vmem>>, %arg5: memref<1x32x256xi8, #tpu.memory_space<vmem>>) attributes {dimension_semantics = [#tpu.dimension_semantics<parallel>, #tpu.dimension_semantics<parallel>], iteration_bounds = array<i64: 2, 1>, scalar_prefetch = 0 : i64, scratch_operands = 0 : i64, tpu.core_type = #tpu.core_type<tc>, window_params = [{transform_indices = @transform_0, window_bounds = array<i64: 1, 4, 256>}, {pipeline_mode = #tpu.pipeline_mode<synchronous>, transform_indices = @transform_1, window_bounds = array<i64: 32, 4>}, {pipeline_mode = #tpu.pipeline_mode<synchronous>, transform_indices = @transform_2, window_bounds = array<i64: 32, 1>}, {transform_indices = @transform_3, window_bounds = array<i64: 1, 32, 256>}]} {
    %c0 = arith.constant 0 : index
    %c0_0 = arith.constant 0 : index
    %0 = vector.load %arg3[%c0, %c0_0] : memref<32x4xf32, #tpu.memory_space<vmem>>, vector<32x4xf32>
    %c0_1 = arith.constant 0 : index
    %c0_2 = arith.constant 0 : index
    %c0_3 = arith.constant 0 : index
    %1 = vector.load %arg2[%c0_1, %c0_2, %c0_3] : memref<1x4x256xf32, #tpu.memory_space<vmem>>, vector<1x4x256xf32>
    %2 = vector.shape_cast %1 : vector<1x4x256xf32> to vector<4x256xf32>
    %cst = arith.constant dense<0.000000e+00> : vector<32x256xf32>
    %3 = tpu.matmul %0, %2, %cst {dimension_numbers = #tpu.dot_dimension_numbers<[1], [0], [0], [1], [0, 0, 1, 1], [], []>} : vector<32x4xf32>, vector<4x256xf32>, vector<32x256xf32> -> vector<32x256xf32>
    %c0_4 = arith.constant 0 : index
    %c0_5 = arith.constant 0 : index
    %4 = vector.load %arg4[%c0_4, %c0_5] : memref<32x1xf32, #tpu.memory_space<vmem>>, vector<32x1xf32>
    %5 = vector.broadcast %4 : vector<32x1xf32> to vector<32x256xf32>
    %6 = arith.addf %3, %5 : vector<32x256xf32>
    %cst_6 = arith.constant 1.000000e+00 : f32
    %7 = vector.broadcast %cst_6 : f32 to vector<32x256xf32>
    %8 = arith.cmpf oge, %6, %7 : vector<32x256xf32>
    %9 = arith.extui %8 : vector<32x256xi1> to vector<32x256xi8>
    %c0_7 = arith.constant 0 : index
    %c0_8 = arith.constant 0 : index
    %c0_9 = arith.constant 0 : index
    %10 = vector.load %arg5[%c0_7, %c0_8, %c0_9] : memref<1x32x256xi8, #tpu.memory_space<vmem>>, vector<1x32x256xi8>
    %11 = vector.shape_cast %10 : vector<1x32x256xi8> to vector<32x256xi8>
    %12 = vector.shape_cast %9 : vector<32x256xi8> to vector<1x32x256xi8>
    tpu.vector_store %arg5[%c0_7, %c0_8, %c0_9], %12 {strides = array<i32>} : memref<1x32x256xi8, #tpu.memory_space<vmem>>, vector<1x32x256xi8>,
    return
  }
  func.func @transform_0(%arg0: i32, %arg1: i32) -> (i32, i32, i32) {
    %c0_i32 = arith.constant 0 : i32
    %c0_i32_0 = arith.constant 0 : i32
    return %arg0, %c0_i32, %arg1 : i32, i32, i32
  }
  func.func @transform_1(%arg0: i32, %arg1: i32) -> (i32, i32) {
    %c0_i32 = arith.constant 0 : i32
    %c0_i32_0 = arith.constant 0 : i32
    %c0_i32_1 = arith.constant 0 : i32
    return %c0_i32, %c0_i32_0 : i32, i32
  }
  func.func @transform_2(%arg0: i32, %arg1: i32) -> (i32, i32) {
    %c0_i32 = arith.constant 0 : i32
    %c0_i32_0 = arith.constant 0 : i32
    %c0_i32_1 = arith.constant 0 : i32
    return %c0_i32, %c0_i32_0 : i32, i32
  }
  func.func @transform_3(%arg0: i32, %arg1: i32) -> (i32, i32, i32) {
    %c0_i32 = arith.constant 0 : i32
    %c0_i32_0 = arith.constant 0 : i32
    return %arg0, %c0_i32, %arg1 : i32, i32, i32
  }
}

</mosaic_0001>

<bundles_post_ra>
// kernel: tpu_custom_call.1
= control target key start
LH: loop header
LB: loop body
LE: loop exit
PB: predicated region body
PF: predicated region fallthrough
CT: control target
= control target key end

     0   :  { %8 = vsyncpa [#allocation3], 0  ;;  %s781_s0 = inlined_call_operand.vmem [shape: f32[2,4,256], index: 0, kind: input, shape index: {}]   ;;  %s782_s1 = inlined_call_operand.vmem [shape: f32[32,4], index: 1, kind: input, shape index: {}]   ;;  %s783_s2 = inlined_call_operand.vmem [shape: f32[32,1], index: 2, kind: input, shape index: {}]   ;;  %s784_s3 = inlined_call_operand.hbm [shape: s8[2,32,256], index: 3, kind: output, shape index: {}]  }
   0x1   :  { %10 = vsyncpa [#allocation3 + $0x1], 0  ;;  %s637_s12 = smov 0   ;;  %s639_s13 = smov 0  }
   0x2   :  { %s641_s14 = smov 0   ;;  %s643_s15 = smov 0  }
   0x3   :  { %s645_s16 = smov 0   ;;  %s647_s17 = smov 0  }
   0x4 LB: > { %s451_s18 = sadd.s32 4294967295, %s612_s17   ;;  %s452_s19 = sadd.s32 4294967294, %s612_s17   ;;  %s612_s17 = sphi %s647_s17, %s16_s17   ;;  %s608_s16 = sphi %s645_s16, %s791_s16   ;;  %s604_s15 = sphi %s643_s15, %s790_s15   ;;  %s600_s14 = sphi %s641_s14, %s789_s14   ;;  %s596_s13 = sphi %s639_s13, %s788_s13   ;;  %s592_s12 = sphi %s637_s12, %s787_s12  }
   0x5   : > { %s28_s20 = sadd.s32 1, %s608_s16  ;;  %s107_s21 = sadd.s32 1, %s600_s14 }
   0x6   : > { %p30_p0 = scmp.ge.s32.totalorder %s28_s20, 2  ;;  %p117_p1 = scmp.ne.s32.totalorder %s600_s14, %s596_s13 }
   0x7   : > { %p118_p2 = scmp.eq.s32.totalorder %s451_s18, 1  ;;  %p123_p3 = scmp.ne.s32.totalorder %s596_s13, %s592_s12 }
   0x8   : > { %s793_s20 = smov (%p30_p0, %s28_s20), 0  ;;  %p124_p5 = scmp.eq.s32.totalorder %s452_s19, 1 }
   0x9   : > { %p677_p4 = por %p118_p2, %p117_p1  ;;  %s102_s23 = ssub.s32 %s608_s16, %s793_s20 }
   0xa   : > { %p455_p6 = scmp.ge.s32.totalorder %s612_s17, 1  ;;  %p105_p7 = scmp.eq.s32.totalorder %s102_s23, 0 }
   0xb   : > { %p684_p8 = por %p124_p5, %p123_p3  ;;  %p161_p9 = scmp.lt.s32.totalorder %s612_s17, 3 }
   0xc   : > { %s690_s25 = scalar_select %p105_p7, %s600_s14, %s107_s21  }
   0xd   : > { %p162_p10 = pnand %p455_p6, %p161_p9 }
   0xe   : > { %p190_p11 = scmp.lt.s32.totalorder (!%p162_p10), %s604_s15, 1  ;;  %v614_v0 = vmov (!%p162_p10), 0.0   ;;  %v209_v1 = vld [vmem:[%s783_s2 + $0x10] sm:$0xff] (!%p162_p10)  ;;  %v615_v2 = vmov (!%p162_p10), 0   ;;  %v207_v3 = vld [vmem:[%s783_s2] sm:$0xff] (!%p162_p10)  ;;  %v210_v4 = vld [vmem:[%s783_s2 + $0x18] sm:$0xff] (!%p162_p10) }
   0xf   : > { %165 = sbr.rel (%p162_p10) target bundleno = 271 (0x10f), region = 32  ;;  %315 = vmatprep.mubr.f32.mxu0 (!%p162_p10), %v614_v0  ;;  %327 = vmatprep.mubr.f32.mxu1 (!%p162_p10), %v614_v0  ;;  %v208_v5 = vld [vmem:[%s783_s2 + $0x8] sm:$0xff] (!%p162_p10)  ;;  %vm246_vm0 = vcmask (!%p162_p10), 1043456   ;;  %v202_v8 = vld [vmem:[%s782_s1] sm:$0xff] (!%p162_p10)  ;;  %vm233_vm1 = vcmask (!%p162_p10), 31744   ;;  %v204_v9 = vld [vmem:[%s782_s1 + $0x10] sm:$0xff] (!%p162_p10) }
  0x10   : > { %532 = vset.pattern.permute.xlu1 (!%p162_p10), %v615_v2  ;;  %531 = vset.pattern.permute.xlu0 (!%p162_p10), %v615_v2  ;;  %v203_v10 = vld [vmem:[%s782_s1 + $0x8] sm:$0xff] (!%p162_p10)  ;;  %v205_v11 = vld [vmem:[%s782_s1 + $0x18] sm:$0xff] (!%p162_p10)  ;;  %s186_s30 = sand.u32 (!%p162_p10), 1, %s596_s13   ;;  %s471_s5 = sshll.u32 (!%p162_p10), %s604_s15, 8 }
  0x11   : > { %223 = vperm.xlu1 (!%p162_p10), %532, %v209_v1   ;;  %213 = vperm.xlu0 (!%p162_p10), %531, %v207_v3   ;;  %s731_s10 = scalar_lea.hbm (!%p162_p10), %s784_s3, %s471_s5  ;;  %s616_s18 = smov (!%p162_p10), [#allocation2]  }
  0x12   : > { %s538_s19 = sshll.u32 (!%p162_p10), %s616_s18, 4  ;;  %s539_s19 = int_to_ptr.vmem [resolvable:$false] %s538_s19 }
  0x13   : > { %s540_s21 = scalar_lea.vmem (!%p162_p10), %s539_s19, 512 }
  0x15   : > { %228 = vperm.xlu1 (!%p162_p10), %532, %v210_v4   ;;  %218 = vperm.xlu0 (!%p162_p10), %531, %v208_v5  }
  0x16   : > { %s191_s28 = scalar_select %p190_p11, %s604_s15, 1 }
  0x17   : > { %s359_s15 = scalar_lea.sflag [#allocation3], %s186_s30 }
  0x18   : > { %s470_s4 = sshll.u32 %s191_s28, 3 }
  0x19   : > { %s197_s11 = scalar_lea.vmem %s781_s0, %s470_s4  ;;  %s456_s4 = sshll.u32 %s186_s30, 4 }
  0x1a   : > { %v206_v6 = vld [vmem:[%s197_s11] sm:$0xff]  ;;  %s188_s6 = scalar_lea.vmem [#allocation2], %s456_s4 }
  0x1b   : > { %v232_v7 = vcombine.high %v206_v6, %v206_v6  ;;  %s375_s7 = sshll.u32 %s188_s6, 4  ;;  %s733_s7 = int_to_ptr.vmem [resolvable:$true] %s375_s7 }
  0x1c   : > { %s534_s11 = scalar_lea.vmem %s733_s7, 256  ;;  %p541_p1 = scmp.lt.s32.totalorder %s733_s7, %s539_s19 }
  0x1d   : > { %459 = vmatprep.subr.msk.mxu0 %vm246_vm0, %v232_v7  ;;  %472 = vmatprep.subr.msk.mxu1 %vm246_vm0, %v232_v7  ;;  %p535_p12 = scmp.ne.s32.totalorder %s733_s7, %s534_s11  ;;  %p542_p2 = scmp.lt.s32.totalorder %s540_s21, %s534_s11 }
  0x1e   : > { %460 = vmatpush1.msk.msra.mxu0 %vm246_vm0, %v206_v6  ;;  %473 = vmatpush1.msk.msra.mxu1 %vm246_vm0, %v206_v6 }
  0x1f   : > { %461 = vmatmul.mubr.msk.f32.vlgmr.msra.gmra.mrb[0].mxu0 %vm233_vm1, %v202_v8  ;;  %463 = vmatmul.mubr.msk.f32.vlgmr.msra.gmra.mrb[0].mxu1 %vm233_vm1, %v204_v9  ;;  %p536_p13 = pnand %p535_p12, %p677_p4  ;;  %p543_p3 = por %p542_p2, %p541_p1 }
  0x20   : > { %321 = vmatprep.mubr.f32.mxu0 %v614_v0  ;;  %333 = vmatprep.mubr.f32.mxu1 %v614_v0 }
  0x21   : > { %p537_p0 = pneg %p536_p13 }
  0x23   : > { %462 = vmatmul.mubr.msk.f32.gmra.mrb[2].mxu0 %vm233_vm1, %v203_v10  ;;  %464 = vmatmul.mubr.msk.f32.gmra.mrb[2].mxu1 %vm233_vm1, %v205_v11  ;;  %p544_p5 = pnand %p543_p3, %p537_p0 }
  0x90   : > { %v224_v12 = vpop.permute.xlu1 %223  ;;  %v214_v13 = vpop.permute.xlu0 %213 }
  0x94   : > { %v229_v19 = vpop.permute.xlu1 %228  ;;  %v219_v20 = vpop.permute.xlu0 %218 }
  0xf2   : > { %v317_v14 = vpop.f32.mrb[0].mxu0  ;;  %v329_v15 = vpop.f32.mrb[0].mxu1 }
  0xf3   : > { %v319_v16 = vpop.f32.mrb[1].mxu0  ;;  %v331_v17 = vpop.f32.mrb[1].mxu1  ;;  %v318_v18 = vadd.f32 %v317_v14, %v214_v13  ;;  %v330_v21 = vadd.f32 %v329_v15, %v224_v12 }
  0xf4   : > { %v320_v28 = vadd.f32 %v319_v16, %v214_v13  ;;  %v332_v31 = vadd.f32 %v331_v17, %v224_v12 }
  0xf5   : > { %vm340_vm2 = vcmp.ge.f32.partialorder %v318_v18, 1.0  ;;  %vm344_vm5 = vcmp.ge.f32.partialorder %v330_v21, 1.0 }
  0xf6   : > { %v323_v22 = vpop.f32.mrb[2].mxu0  ;;  %v335_v23 = vpop.f32.mrb[2].mxu1  ;;  %vm341_vm10 = vcmp.ge.f32.partialorder %v320_v28, 1.0  ;;  %vm345_vm12 = vcmp.ge.f32.partialorder %v332_v31, 1.0 }
  0xf7   : > { %v324_v24 = vadd.f32 %v323_v22, %v219_v20  ;;  %v336_v25 = vadd.f32 %v335_v23, %v229_v19  ;;  %v325_v26 = vpop.f32.mrb[3].mxu0  ;;  %v337_v27 = vpop.f32.mrb[3].mxu1 }
  0xf8   : > { %v326_v29 = vadd.f32 %v325_v26, %v219_v20  ;;  %v338_v30 = vadd.f32 %v337_v27, %v229_v19 }
  0xf9   : > { %vm342_vm3 = vcmp.ge.f32.partialorder %v324_v24, 1.0  ;;  %vm346_vm4 = vcmp.ge.f32.partialorder %v336_v25, 1.0 }
  0xfa   : > { %vm348_vm6 = vmpackc.low %vm342_vm3, %vm340_vm2  ;;  %vm343_vm7 = vcmp.ge.f32.partialorder %v326_v29, 1.0  ;;  %vm347_vm9 = vcmp.ge.f32.partialorder %v338_v30, 1.0 }
  0xfb   : > { %vm349_vm8 = vmpackc.low %vm346_vm4, %vm344_vm5 }
  0xfc   : > { %vm350_vm11 = vmpackc.even %vm349_vm8, %vm348_vm6 }
  0xfd   : > { %v354_v32 = vsel %vm350_vm11, 16843009, %v615_v2  ;;  %vm351_vm13 = vmpackc.low %vm343_vm7, %vm341_vm10 }
  0xfe   : > { %356 = vst [vmem:[%s188_s6] sm:$0xff] %v354_v32  ;;  %vm352_vm14 = vmpackc.low %vm347_vm9, %vm345_vm12 }
  0xff   : > { %vm353_vm15 = vmpackc.even %vm352_vm14, %vm351_vm13 }
 0x100   : > { %v355_v33 = vsel %vm353_vm15, 16843009, %v615_v2 }
 0x101   : > { %357 = vst [vmem:[%s188_s6 + $0x8] sm:$0xff] %v355_v33 }
 0x102   : > { %547 = shalt.err (!%p544_p5)
}
 0x103   : > { %s548_s23 = scalar_lea.hbm %s731_s10, 256  ;;  %s552_s28 = scalar_lea.hbm %s784_s3, 512 }
 0x104   : > { %p549_p6 = scmp.ne.s32.totalorder %s731_s10, %s548_s23  ;;  %p553_p10 = scmp.lt.u32.totalorder %s731_s10, %s784_s3 }
 0x105   : > { %p554_p11 = scmp.lt.u32.totalorder %s552_s28, %s548_s23  ;;  %p556_p13 = scmp.lt.u32.totalorder %s548_s23, %s731_s10 }
 0x106   : > { %p550_p7 = pnand %p549_p6, %p677_p4 }
 0x107   : > { %p555_p12 = por %p554_p11, %p553_p10 }
 0x108   : > { %p551_p9 = pneg %p550_p7 }
 0x109   : > { %p557_p0 = por %p556_p13, %p555_p12 }
 0x10b   : > { %p558_p1 = pnand %p557_p0, %p551_p9 }
 0x10d   : > { %561 = shalt.err (!%p558_p1)
}
 0x10e   : > { %474 = dma.vmem_to_hbm [thread:$0]  (%p677_p4), %s733_s7, 256, %s731_s10, %s359_s15  }
 0x10f PF: > { %p480_p2 = scmp.ge.s32.totalorder %s612_s17, 2  ;;  %s387_s4 = sand.u32 1, %s592_s12  }
 0x110   : > { %s388_s5 = scalar_lea.sflag [#allocation3], %s387_s4 }
 0x111   : > { %p477_p3 = pnand %p480_p2, %p684_p8 }
 0x113   : > { %587 = dma.done.wait (!%p477_p3), %s388_s5, 256  }
 0x114   : > { %589 = vsyncadd (!%p477_p3), %s388_s5, 4294967040  ;;  %s16_s17 = sadd.s32 1, %s612_s17   ;;  %s787_s12 = smov %s596_s13 }
 0x115   : > { %p13_p5 = scmp.ge.s32.totalorder %s16_s17, 4   ;;  %s788_s13 = smov %s600_s14 }
 0x116   : > { %s789_s14 = smov %s690_s25  ;;  %s790_s15 = smov %s608_s16 }
 0x117   : > { %s791_s16 = smov %s793_s20  ;;  %15 = sbr.rel (!%p13_p5) target bundleno = 4 (0x4), region = 67 }
 0x11e   :  { %393 = vsyncpa [#allocation3], 1 }
 0x11f   :  { %395 = vsyncpa [#allocation3 + $0x1], 1 }

</bundles_post_ra>
